<compile_context>
chip_gen: v7x
topology: tpu7x:2x2x1
jax: 0.10.0
libtpu: 0.0.40
codegen_flags: <defaults>
</compile_context>

<pallas_src>
import functools

import jax
import jax.numpy as jnp
from jax import lax
from jax.experimental import pallas as pl
from jax.experimental.pallas import tpu as pltpu


# ---------------------------------------------------------------------------
# Fused Pallas kernel: one grid step = Bblk images, all stages on VMEM values.
# ---------------------------------------------------------------------------
def _basic_block_kernel(x_ref, mask_ref, w1_ref, b1_ref, w2_ref, b2_ref,
                        o_ref, *, W, has_downsample):
    """x_ref:    (Bblk, Cin, H*W)  f32 (NCHW, spatial flattened -> lane dim)
       mask_ref: (9, H*W)          f32 per-tap validity mask (1 inside image)
       w1_ref:   (Cmid, 9*Cin)     compute dtype, BN1 scale folded in
       b1_ref:   (Cmid, 1)         f32 BN1 shift
       w2_ref:   (Cout, 9*Cmid[+Cin]) compute dtype, BN2 scale folded in
                                   (+ BN-folded 1x1 downsample weights)
       b2_ref:   (Cout, 1)         f32 BN2 shift (+ downsample BN shift)
       o_ref:    (Bblk, Cout, H*W) f32
    """
    cdt = w1_ref.dtype
    n_b, _, HW = x_ref.shape
    mask = mask_ref[...]
    w1 = w1_ref[...]
    w2 = w2_ref[...]
    b1 = b1_ref[...]
    b2 = b2_ref[...]
    mrows = [mask[t:t + 1, :] for t in range(9)]        # hoisted (1, H*W) rows

    def im2col_taps(img):
        # img: (C, H*W) f32 -> list of the 9 shifted+masked tap copies.
        # Tap t=(kh,kw), di=kh-1, dj=kw-1: value at flat position f=i*W+j is
        # img[f + di*W + dj] when (i+di, j+dj) is inside the image, else 0.
        # pltpu.roll follows jnp.roll semantics, so shift = -(di*W+dj) mod H*W;
        # the mask zeroes both the row-wrap and image-wrap positions.
        pieces = []
        for t in range(9):
            di, dj = t // 3 - 1, t % 3 - 1
            if di == 0 and dj == 0:
                pieces.append(img)          # centre tap: no shift, always valid
            else:
                shift = (-(di * W + dj)) % HW
                pieces.append(pltpu.roll(img, shift, 1) * mrows[t])
        return pieces

    for b in range(n_b):                    # static unroll over the batch tile
        x = x_ref[b]                                          # (Cin, H*W) f32
        # conv1 (3x3, pad 1, no bias) + BN1 (scale in w1, shift b1) + ReLU
        slab1 = jnp.concatenate(im2col_taps(x), axis=0).astype(cdt)
        h1 = jnp.dot(w1, slab1, preferred_element_type=jnp.float32) + b1
        h1 = jnp.maximum(h1, 0.0)                             # (Cmid, H*W) f32
        # conv2 (3x3, pad 1) + BN2, with the 1x1 shortcut fused as extra K rows
        pieces2 = im2col_taps(h1)
        if has_downsample:
            pieces2.append(x)
        slab2 = jnp.concatenate(pieces2, axis=0).astype(cdt)
        h2 = jnp.dot(w2, slab2, preferred_element_type=jnp.float32) + b2
        # identity == 0 when there is no downsample (the "cut residual" path)
        o_ref[b] = jnp.maximum(h2, 0.0).astype(o_ref.dtype)


# ---------------------------------------------------------------------------
# Wrapper: BN folding / weight re-layout (done once) + a single pallas_call.
# ---------------------------------------------------------------------------
def _fold_bn(gamma, beta, mean, var, eps=1e-5):
    scale = gamma / jnp.sqrt(var + eps)
    return scale, beta - scale * mean


def _prep_conv3x3(w_oihw, scale, dtype):
    # PyTorch (Cout, Cin, 3, 3) -> (Cout, 9*Cin), BN scale folded in, with the
    # K ordering (tap-major, then input channel) matching the im2col slab.
    O, C, KH, KW = w_oihw.shape
    w = w_oihw * scale.reshape(-1, 1, 1, 1)
    return jnp.transpose(w, (0, 2, 3, 1)).reshape(O, KH * KW * C).astype(dtype)


def _tap_masks(H, W):
    ii = jnp.arange(H, dtype=jnp.int32).reshape(H, 1)
    jj = jnp.arange(W, dtype=jnp.int32).reshape(1, W)
    rows = []
    for di in (-1, 0, 1):
        for dj in (-1, 0, 1):
            valid = ((ii + di >= 0) & (ii + di < H) &
                     (jj + dj >= 0) & (jj + dj < W))
            rows.append(valid.reshape(H * W))
    return jnp.stack(rows, axis=0).astype(jnp.float32)          # (9, H*W)


def _pick_batch_block(B):
    # <= 8 images per step; keep >= 2 grid steps so both v7x cores get work.
    for bb in (8, 4, 2):
        if B % bb == 0 and B // bb >= 2:
            return bb
    return 1


def basic_block_cut_residual(x_nchw, params, *, stride=1,
                             compute_dtype=jnp.float32, interpret=False):
    """Forward of BasicBlockcutResidual (inference-mode BatchNorm).

    x_nchw: (B, Cin, H, W) float32 (PyTorch layout). Returns (B, Cout, H, W).
    compute_dtype: dtype of the matmul operands (jnp.bfloat16 recommended on
    v6e/v7x); accumulation and the bias/ReLU epilogue always stay in float32.
    """
    if stride != 1:
        # TODO(synk): strided conv / spatial downsample not implemented.
        raise NotImplementedError("stride != 1 not supported")

    B, Cin, H, W = x_nchw.shape
    HW = H * W
    x = x_nchw.reshape(B, Cin, HW).astype(jnp.float32)        # free reshape

    s1, sh1 = _fold_bn(params["bn1_gamma"], params["bn1_beta"],
                       params["bn1_mean"], params["bn1_var"])
    s2, sh2 = _fold_bn(params["bn2_gamma"], params["bn2_beta"],
                       params["bn2_mean"], params["bn2_var"])
    w1 = _prep_conv3x3(params["conv1_w"], s1, compute_dtype)
    w2 = _prep_conv3x3(params["conv2_w"], s2, compute_dtype)
    Cmid, Cout = w1.shape[0], w2.shape[0]
    b1 = sh1.astype(jnp.float32).reshape(Cmid, 1)
    b2 = sh2

    has_downsample = "ds_conv_w" in params
    if has_downsample:
        sd, shd = _fold_bn(params["ds_bn_gamma"], params["ds_bn_beta"],
                           params["ds_bn_mean"], params["ds_bn_var"])
        wds = params["ds_conv_w"][:, :, 0, 0] * sd.reshape(-1, 1)  # (Cout, Cin)
        w2 = jnp.concatenate([w2, wds.astype(compute_dtype)], axis=1)
        b2 = b2 + shd
    b2 = b2.astype(jnp.float32).reshape(Cout, 1)
    K2 = w2.shape[1]

    mask = _tap_masks(H, W)
    Bblk = _pick_batch_block(B)
    kernel = functools.partial(_basic_block_kernel, W=W,
                               has_downsample=has_downsample)

    out = pl.pallas_call(
        kernel,
        out_shape=jax.ShapeDtypeStruct((B, Cout, HW), jnp.float32),
        grid=(B // Bblk,),
        in_specs=[
            pl.BlockSpec((Bblk, Cin, HW), lambda b: (b, 0, 0)),
            pl.BlockSpec((9, HW), lambda b: (0, 0)),
            pl.BlockSpec((Cmid, 9 * Cin), lambda b: (0, 0)),
            pl.BlockSpec((Cmid, 1), lambda b: (0, 0)),
            pl.BlockSpec((Cout, K2), lambda b: (0, 0)),
            pl.BlockSpec((Cout, 1), lambda b: (0, 0)),
        ],
        out_specs=pl.BlockSpec((Bblk, Cout, HW), lambda b: (b, 0, 0)),
        compiler_params=pltpu.CompilerParams(
            dimension_semantics=("parallel",)),
        interpret=interpret,
    )(x, mask, w1, b1, w2, b2)

    return out.reshape(B, Cout, H, W)                         # free reshape


# ---------------------------------------------------------------------------
# Pure-JAX reference (XLA convs) for correctness checking.
# ---------------------------------------------------------------------------
def basic_block_reference(x_nchw, params, *, stride=1):
    x = x_nchw.astype(jnp.float32)

    def conv(x, w, s, pad):
        return lax.conv_general_dilated(
            x, w, window_strides=(s, s), padding=pad,
            dimension_numbers=("NCHW", "OIHW", "NCHW"),
            precision=lax.Precision.HIGHEST)

    def bn(y, g, b, m, v, eps=1e-5):
        rs = lambda a: a.reshape(1, -1, 1, 1)
        return (y - rs(m)) / jnp.sqrt(rs(v) + eps) * rs(g) + rs(b)

    out = conv(x, params["conv1_w"], stride, ((1, 1), (1, 1)))
    out = bn(out, params["bn1_gamma"], params["bn1_beta"],
             params["bn1_mean"], params["bn1_var"])
    out = jnp.maximum(out, 0.0)
    out = conv(out, params["conv2_w"], 1, ((1, 1), (1, 1)))
    out = bn(out, params["bn2_gamma"], params["bn2_beta"],
             params["bn2_mean"], params["bn2_var"])
    identity = 0.0
    if "ds_conv_w" in params:
        identity = conv(x, params["ds_conv_w"], stride, ((0, 0), (0, 0)))
        identity = bn(identity, params["ds_bn_gamma"], params["ds_bn_beta"],
                      params["ds_bn_mean"], params["ds_bn_var"])
    return jnp.maximum(out + identity, 0.0)


# ---------------------------------------------------------------------------
# Deterministic parameter construction (PyTorch weight layouts).
# ---------------------------------------------------------------------------
def init_params(key, inplanes, planes, *, with_downsample):
    ks = jax.random.split(key, 15)

    def bn_params(k0, k1, k2, k3, c):
        return (1.0 + 0.1 * jax.random.normal(k0, (c,), jnp.float32),
                0.1 * jax.random.normal(k1, (c,), jnp.float32),
                0.1 * jax.random.normal(k2, (c,), jnp.float32),
                jax.random.uniform(k3, (c,), jnp.float32, 0.5, 1.5))

    p = {}
    p["conv1_w"] = 0.1 * jax.random.normal(ks[0], (planes, inplanes, 3, 3), jnp.float32)
    (p["bn1_gamma"], p["bn1_beta"],
     p["bn1_mean"], p["bn1_var"]) = bn_params(ks[1], ks[2], ks[3], ks[4], planes)
    p["conv2_w"] = 0.1 * jax.random.normal(ks[5], (planes, planes, 3, 3), jnp.float32)
    (p["bn2_gamma"], p["bn2_beta"],
     p["bn2_mean"], p["bn2_var"]) = bn_params(ks[6], ks[7], ks[8], ks[9], planes)
    if with_downsample:
        p["ds_conv_w"] = 0.1 * jax.random.normal(ks[10], (planes, inplanes, 1, 1), jnp.float32)
        (p["ds_bn_gamma"], p["ds_bn_beta"],
         p["ds_bn_mean"], p["ds_bn_var"]) = bn_params(ks[11], ks[12], ks[13], ks[14], planes)
    return p


if __name__ == "__main__":
    root = jax.random.PRNGKey(0)
    kx1, kp1, kx2, kp2 = jax.random.split(root, 4)

    # Config 1: the "cut residual" path (downsample is None -> identity = 0).
    B, Cin, H, W, planes = 2, 16, 16, 16, 16
    x1 = jax.random.normal(kx1, (B, Cin, H, W), jnp.float32)
    p1 = init_params(kp1, Cin, planes, with_downsample=False)
    out1 = jax.block_until_ready(jax.jit(basic_block_cut_residual)(x1, p1))
    ref1 = basic_block_reference(x1, p1)
    assert out1.shape == (B, planes, H, W), out1.shape
    err1 = float(jnp.max(jnp.abs(out1 - ref1)))
    assert err1 < 1e-2, f"config1 max err {err1}"

    # Config 2: channel-changing block -> fused 1x1 conv + BN shortcut.
    Cin2, planes2 = 8, 32
    x2 = jax.random.normal(kx2, (B, Cin2, H, W), jnp.float32)
    p2 = init_params(kp2, Cin2, planes2, with_downsample=True)
    out2 = jax.block_until_ready(jax.jit(basic_block_cut_residual)(x2, p2))
    ref2 = basic_block_reference(x2, p2)
    assert out2.shape == (B, planes2, H, W), out2.shape
    err2 = float(jnp.max(jnp.abs(out2 - ref2)))
    assert err2 < 1e-2, f"config2 max err {err2}"

    # Config 3: same block, bf16 matmul operands (v6e/v7x MXU fast path);
    # accumulation/epilogue stay f32, so the tolerance is looser.
    run_bf16 = jax.jit(functools.partial(basic_block_cut_residual,
                                         compute_dtype=jnp.bfloat16))
    out3 = jax.block_until_ready(run_bf16(x2, p2))
    assert out3.shape == (B, planes2, H, W), out3.shape
    err3 = float(jnp.max(jnp.abs(out3 - ref2)))
    assert err3 < 1.5e-1, f"config3 (bf16) max err {err3}"

    print("KERNEL_OK")
</pallas_src>

<mosaic_0001>
module attributes {stable_mosaic.version = 11 : i64} {
  func.func @_basic_block_kernel(%arg0: i32, %arg1: memref<1x16x256xf32, #tpu.memory_space<vmem>>, %arg2: memref<9x256xf32, #tpu.memory_space<vmem>>, %arg3: memref<16x144xf32, #tpu.memory_space<vmem>>, %arg4: memref<16x1xf32, #tpu.memory_space<vmem>>, %arg5: memref<16x144xf32, #tpu.memory_space<vmem>>, %arg6: memref<16x1xf32, #tpu.memory_space<vmem>>, %arg7: memref<1x16x256xf32, #tpu.memory_space<vmem>>) attributes {dimension_semantics = [#tpu.dimension_semantics<parallel>], iteration_bounds = array<i64: 2>, scalar_prefetch = 0 : i64, scratch_operands = 0 : i64, tpu.core_type = #tpu.core_type<tc>, window_params = [{transform_indices = @transform_0, window_bounds = array<i64: 1, 16, 256>}, {pipeline_mode = #tpu.pipeline_mode<synchronous>, transform_indices = @transform_1, window_bounds = array<i64: 9, 256>}, {pipeline_mode = #tpu.pipeline_mode<synchronous>, transform_indices = @transform_2, window_bounds = array<i64: 16, 144>}, {pipeline_mode = #tpu.pipeline_mode<synchronous>, transform_indices = @transform_3, window_bounds = array<i64: 16, 1>}, {pipeline_mode = #tpu.pipeline_mode<synchronous>, transform_indices = @transform_4, window_bounds = array<i64: 16, 144>}, {pipeline_mode = #tpu.pipeline_mode<synchronous>, transform_indices = @transform_5, window_bounds = array<i64: 16, 1>}, {transform_indices = @transform_6, window_bounds = array<i64: 1, 16, 256>}]} {
    %c0 = arith.constant 0 : index
    %c0_0 = arith.constant 0 : index
    %0 = vector.load %arg2[%c0, %c0_0] : memref<9x256xf32, #tpu.memory_space<vmem>>, vector<9x256xf32>
    %c0_1 = arith.constant 0 : index
    %c0_2 = arith.constant 0 : index
    %1 = vector.load %arg3[%c0_1, %c0_2] : memref<16x144xf32, #tpu.memory_space<vmem>>, vector<16x144xf32>
    %c0_3 = arith.constant 0 : index
    %c0_4 = arith.constant 0 : index
    %2 = vector.load %arg5[%c0_3, %c0_4] : memref<16x144xf32, #tpu.memory_space<vmem>>, vector<16x144xf32>
    %c0_5 = arith.constant 0 : index
    %c0_6 = arith.constant 0 : index
    %3 = vector.load %arg4[%c0_5, %c0_6] : memref<16x1xf32, #tpu.memory_space<vmem>>, vector<16x1xf32>
    %c0_7 = arith.constant 0 : index
    %c0_8 = arith.constant 0 : index
    %4 = vector.load %arg6[%c0_7, %c0_8] : memref<16x1xf32, #tpu.memory_space<vmem>>, vector<16x1xf32>
    %5 = vector.extract_strided_slice %0 {offsets = [0, 0], sizes = [1, 256], strides = [1, 1]} : vector<9x256xf32> to vector<1x256xf32>
    %6 = vector.extract_strided_slice %0 {offsets = [1, 0], sizes = [1, 256], strides = [1, 1]} : vector<9x256xf32> to vector<1x256xf32>
    %7 = vector.extract_strided_slice %0 {offsets = [2, 0], sizes = [1, 256], strides = [1, 1]} : vector<9x256xf32> to vector<1x256xf32>
    %8 = vector.extract_strided_slice %0 {offsets = [3, 0], sizes = [1, 256], strides = [1, 1]} : vector<9x256xf32> to vector<1x256xf32>
    %9 = vector.extract_strided_slice %0 {offsets = [5, 0], sizes = [1, 256], strides = [1, 1]} : vector<9x256xf32> to vector<1x256xf32>
    %10 = vector.extract_strided_slice %0 {offsets = [6, 0], sizes = [1, 256], strides = [1, 1]} : vector<9x256xf32> to vector<1x256xf32>
    %11 = vector.extract_strided_slice %0 {offsets = [7, 0], sizes = [1, 256], strides = [1, 1]} : vector<9x256xf32> to vector<1x256xf32>
    %12 = vector.extract_strided_slice %0 {offsets = [8, 0], sizes = [1, 256], strides = [1, 1]} : vector<9x256xf32> to vector<1x256xf32>
    %c0_9 = arith.constant 0 : index
    %c0_10 = arith.constant 0 : index
    %c0_11 = arith.constant 0 : index
    %13 = vector.load %arg1[%c0_9, %c0_10, %c0_11] : memref<1x16x256xf32, #tpu.memory_space<vmem>>, vector<1x16x256xf32>
    %14 = vector.shape_cast %13 : vector<1x16x256xf32> to vector<16x256xf32>
    %c17_i32 = arith.constant 17 : i32
    %15 = tpu.dynamic_rotate %14 by %c17_i32 dim 1 : vector<16x256xf32>, i32 -> vector<16x256xf32>
    %16 = vector.broadcast %5 : vector<1x256xf32> to vector<16x256xf32>
    %17 = arith.mulf %15, %16 : vector<16x256xf32>
    %c16_i32 = arith.constant 16 : i32
    %18 = tpu.dynamic_rotate %14 by %c16_i32 dim 1 : vector<16x256xf32>, i32 -> vector<16x256xf32>
    %19 = vector.broadcast %6 : vector<1x256xf32> to vector<16x256xf32>
    %20 = arith.mulf %18, %19 : vector<16x256xf32>
    %c15_i32 = arith.constant 15 : i32
    %21 = tpu.dynamic_rotate %14 by %c15_i32 dim 1 : vector<16x256xf32>, i32 -> vector<16x256xf32>
    %22 = vector.broadcast %7 : vector<1x256xf32> to vector<16x256xf32>
    %23 = arith.mulf %21, %22 : vector<16x256xf32>
    %c1_i32 = arith.constant 1 : i32
    %24 = tpu.dynamic_rotate %14 by %c1_i32 dim 1 : vector<16x256xf32>, i32 -> vector<16x256xf32>
    %25 = vector.broadcast %8 : vector<1x256xf32> to vector<16x256xf32>
    %26 = arith.mulf %24, %25 : vector<16x256xf32>
    %c255_i32 = arith.constant 255 : i32
    %27 = tpu.dynamic_rotate %14 by %c255_i32 dim 1 : vector<16x256xf32>, i32 -> vector<16x256xf32>
    %28 = vector.broadcast %9 : vector<1x256xf32> to vector<16x256xf32>
    %29 = arith.mulf %27, %28 : vector<16x256xf32>
    %c241_i32 = arith.constant 241 : i32
    %30 = tpu.dynamic_rotate %14 by %c241_i32 dim 1 : vector<16x256xf32>, i32 -> vector<16x256xf32>
    %31 = vector.broadcast %10 : vector<1x256xf32> to vector<16x256xf32>
    %32 = arith.mulf %30, %31 : vector<16x256xf32>
    %c240_i32 = arith.constant 240 : i32
    %33 = tpu.dynamic_rotate %14 by %c240_i32 dim 1 : vector<16x256xf32>, i32 -> vector<16x256xf32>
    %34 = vector.broadcast %11 : vector<1x256xf32> to vector<16x256xf32>
    %35 = arith.mulf %33, %34 : vector<16x256xf32>
    %c239_i32 = arith.constant 239 : i32
    %36 = tpu.dynamic_rotate %14 by %c239_i32 dim 1 : vector<16x256xf32>, i32 -> vector<16x256xf32>
    %37 = vector.broadcast %12 : vector<1x256xf32> to vector<16x256xf32>
    %38 = arith.mulf %36, %37 : vector<16x256xf32>
    %39 = tpu.concatenate %17, %20, %23, %26, %14, %29, %32, %35, %38 in 0 : vector<16x256xf32>, vector<16x256xf32>, vector<16x256xf32>, vector<16x256xf32>, vector<16x256xf32>, vector<16x256xf32>, vector<16x256xf32>, vector<16x256xf32>, vector<16x256xf32> -> vector<144x256xf32>
    %cst = arith.constant dense<0.000000e+00> : vector<16x256xf32>
    %40 = tpu.matmul %1, %39, %cst {dimension_numbers = #tpu.dot_dimension_numbers<[1], [0], [0], [1], [0, 0, 1, 1], [], []>} : vector<16x144xf32>, vector<144x256xf32>, vector<16x256xf32> -> vector<16x256xf32>
    %41 = vector.broadcast %3 : vector<16x1xf32> to vector<16x256xf32>
    %42 = arith.addf %40, %41 : vector<16x256xf32>
    %cst_12 = arith.constant 0.000000e+00 : f32
    %43 = vector.broadcast %cst_12 : f32 to vector<16x256xf32>
    %44 = arith.maximumf %42, %43 : vector<16x256xf32>
    %c17_i32_13 = arith.constant 17 : i32
    %45 = tpu.dynamic_rotate %44 by %c17_i32_13 dim 1 : vector<16x256xf32>, i32 -> vector<16x256xf32>
    %46 = vector.broadcast %5 : vector<1x256xf32> to vector<16x256xf32>
    %47 = arith.mulf %45, %46 : vector<16x256xf32>
    %c16_i32_14 = arith.constant 16 : i32
    %48 = tpu.dynamic_rotate %44 by %c16_i32_14 dim 1 : vector<16x256xf32>, i32 -> vector<16x256xf32>
    %49 = vector.broadcast %6 : vector<1x256xf32> to vector<16x256xf32>
    %50 = arith.mulf %48, %49 : vector<16x256xf32>
    %c15_i32_15 = arith.constant 15 : i32
    %51 = tpu.dynamic_rotate %44 by %c15_i32_15 dim 1 : vector<16x256xf32>, i32 -> vector<16x256xf32>
    %52 = vector.broadcast %7 : vector<1x256xf32> to vector<16x256xf32>
    %53 = arith.mulf %51, %52 : vector<16x256xf32>
    %c1_i32_16 = arith.constant 1 : i32
    %54 = tpu.dynamic_rotate %44 by %c1_i32_16 dim 1 : vector<16x256xf32>, i32 -> vector<16x256xf32>
    %55 = vector.broadcast %8 : vector<1x256xf32> to vector<16x256xf32>
    %56 = arith.mulf %54, %55 : vector<16x256xf32>
    %c255_i32_17 = arith.constant 255 : i32
    %57 = tpu.dynamic_rotate %44 by %c255_i32_17 dim 1 : vector<16x256xf32>, i32 -> vector<16x256xf32>
    %58 = vector.broadcast %9 : vector<1x256xf32> to vector<16x256xf32>
    %59 = arith.mulf %57, %58 : vector<16x256xf32>
    %c241_i32_18 = arith.constant 241 : i32
    %60 = tpu.dynamic_rotate %44 by %c241_i32_18 dim 1 : vector<16x256xf32>, i32 -> vector<16x256xf32>
    %61 = vector.broadcast %10 : vector<1x256xf32> to vector<16x256xf32>
    %62 = arith.mulf %60, %61 : vector<16x256xf32>
    %c240_i32_19 = arith.constant 240 : i32
    %63 = tpu.dynamic_rotate %44 by %c240_i32_19 dim 1 : vector<16x256xf32>, i32 -> vector<16x256xf32>
    %64 = vector.broadcast %11 : vector<1x256xf32> to vector<16x256xf32>
    %65 = arith.mulf %63, %64 : vector<16x256xf32>
    %c239_i32_20 = arith.constant 239 : i32
    %66 = tpu.dynamic_rotate %44 by %c239_i32_20 dim 1 : vector<16x256xf32>, i32 -> vector<16x256xf32>
    %67 = vector.broadcast %12 : vector<1x256xf32> to vector<16x256xf32>
    %68 = arith.mulf %66, %67 : vector<16x256xf32>
    %69 = tpu.concatenate %47, %50, %53, %56, %44, %59, %62, %65, %68 in 0 : vector<16x256xf32>, vector<16x256xf32>, vector<16x256xf32>, vector<16x256xf32>, vector<16x256xf32>, vector<16x256xf32>, vector<16x256xf32>, vector<16x256xf32>, vector<16x256xf32> -> vector<144x256xf32>
    %cst_21 = arith.constant dense<0.000000e+00> : vector<16x256xf32>
    %70 = tpu.matmul %2, %69, %cst_21 {dimension_numbers = #tpu.dot_dimension_numbers<[1], [0], [0], [1], [0, 0, 1, 1], [], []>} : vector<16x144xf32>, vector<144x256xf32>, vector<16x256xf32> -> vector<16x256xf32>
    %71 = vector.broadcast %4 : vector<16x1xf32> to vector<16x256xf32>
    %72 = arith.addf %70, %71 : vector<16x256xf32>
    %cst_22 = arith.constant 0.000000e+00 : f32
    %73 = vector.broadcast %cst_22 : f32 to vector<16x256xf32>
    %74 = arith.maximumf %72, %73 : vector<16x256xf32>
    %c0_23 = arith.constant 0 : index
    %c0_24 = arith.constant 0 : index
    %c0_25 = arith.constant 0 : index
    %75 = vector.load %arg7[%c0_23, %c0_24, %c0_25] : memref<1x16x256xf32, #tpu.memory_space<vmem>>, vector<1x16x256xf32>
    %76 = vector.shape_cast %75 : vector<1x16x256xf32> to vector<16x256xf32>
    %77 = vector.shape_cast %74 : vector<16x256xf32> to vector<1x16x256xf32>
    tpu.vector_store %arg7[%c0_23, %c0_24, %c0_25], %77 {strides = array<i32>} : memref<1x16x256xf32, #tpu.memory_space<vmem>>, vector<1x16x256xf32>,
    return
  }
  func.func @transform_0(%arg0: i32) -> (i32, i32, i32) {
    %c0_i32 = arith.constant 0 : i32
    %c0_i32_0 = arith.constant 0 : i32
    %c0_i32_1 = arith.constant 0 : i32
    return %arg0, %c0_i32, %c0_i32_0 : i32, i32, i32
  }
  func.func @transform_1(%arg0: i32) -> (i32, i32) {
    %c0_i32 = arith.constant 0 : i32
    %c0_i32_0 = arith.constant 0 : i32
    %c0_i32_1 = arith.constant 0 : i32
    return %c0_i32, %c0_i32_0 : i32, i32
  }
  func.func @transform_2(%arg0: i32) -> (i32, i32) {
    %c0_i32 = arith.constant 0 : i32
    %c0_i32_0 = arith.constant 0 : i32
    %c0_i32_1 = arith.constant 0 : i32
    return %c0_i32, %c0_i32_0 : i32, i32
  }
  func.func @transform_3(%arg0: i32) -> (i32, i32) {
    %c0_i32 = arith.constant 0 : i32
    %c0_i32_0 = arith.constant 0 : i32
    %c0_i32_1 = arith.constant 0 : i32
    return %c0_i32, %c0_i32_0 : i32, i32
  }
  func.func @transform_4(%arg0: i32) -> (i32, i32) {
    %c0_i32 = arith.constant 0 : i32
    %c0_i32_0 = arith.constant 0 : i32
    %c0_i32_1 = arith.constant 0 : i32
    return %c0_i32, %c0_i32_0 : i32, i32
  }
  func.func @transform_5(%arg0: i32) -> (i32, i32) {
    %c0_i32 = arith.constant 0 : i32
    %c0_i32_0 = arith.constant 0 : i32
    %c0_i32_1 = arith.constant 0 : i32
    return %c0_i32, %c0_i32_0 : i32, i32
  }
  func.func @transform_6(%arg0: i32) -> (i32, i32, i32) {
    %c0_i32 = arith.constant 0 : i32
    %c0_i32_0 = arith.constant 0 : i32
    %c0_i32_1 = arith.constant 0 : i32
    return %arg0, %c0_i32, %c0_i32_0 : i32, i32, i32
  }
}

</mosaic_0001>

<bundles_post_ra>
// kernel: basic_block_cut_residual.1
= control target key start
LH: loop header
LB: loop body
LE: loop exit
PB: predicated region body
PF: predicated region fallthrough
CT: control target
= control target key end

     0   :  { %s1018_s21 = smov 0   ;;  %s1543_s0 = inlined_call_operand.vmem [shape: f32[2,16,256], index: 0, kind: input, shape index: {}]   ;;  %s1544_s1 = inlined_call_operand.vmem [shape: f32[9,256], index: 1, kind: input, shape index: {}]   ;;  %s1545_s2 = inlined_call_operand.vmem [shape: f32[16,144], index: 2, kind: input, shape index: {}]   ;;  %s1546_s3 = inlined_call_operand.vmem [shape: f32[16,1], index: 3, kind: input, shape index: {}]   ;;  %s1547_s4 = inlined_call_operand.vmem [shape: f32[16,144], index: 4, kind: input, shape index: {}]   ;;  %s1548_s5 = inlined_call_operand.vmem [shape: f32[16,1], index: 5, kind: input, shape index: {}]   ;;  %s1549_s6 = inlined_call_operand.vmem [shape: f32[2,16,256], index: 6, kind: output, shape index: {}]  }
   0x1 LB: > { %s856_s22 = sadd.s32 4294967295, %s972_s21   ;;  %p860_p0 = scmp.ge.s32.totalorder %s972_s21, 1  ;;  %s972_s21 = sphi %s1018_s21, %s16_s21  }
   0x2   : > { %p212_p1 = scmp.lt.s32.totalorder %s972_s21, 3 }
   0x4   : > { %p213_p2 = pnand %p860_p0, %p212_p1 }
   0x5   : > { %p242_p3 = scmp.lt.s32.totalorder (!%p213_p2), %s856_s22, 1  ;;  %s974_s27 = smov (!%p213_p2), 17   ;;  %v257_v6 = vld [vmem:[%s1545_s2 + $0x8] sm:$0xff] (!%p213_p2)  ;;  %vm484_vm0 = vcmask (!%p213_p2), 130048   ;;  %v982_v7 = vmov (!%p213_p2), 0   ;;  %v264_v8 = vld [vmem:[%s1546_s3] sm:$0xff] (!%p213_p2)  ;;  %v280_v10 = vlaneseq (!%p213_p2) }
   0x6   : > { %216 = sbr.rel (%p213_p2) target bundleno = 827 (0x33b), region = 44  ;;  %s975_s28 = smov (!%p213_p2), 16   ;;  %867 = vmatprep.mubr.msk.f32.mxu0 (!%p213_p2), %vm484_vm0, %v257_v6  ;;  %964 = vset.pattern.permute.xlu0 (!%p213_p2), %v982_v7  ;;  %v265_v9 = vld [vmem:[%s1546_s3 + $0x8] sm:$0xff] (!%p213_p2)  ;;  %v1128_v14 = vld [vmem:[%s1544_s1] sm:$0xff] (!%p213_p2) }
   0x7   : > { %s976_s29 = smov (!%p213_p2), 15   ;;  %s977_s30 = smov (!%p213_p2), 1   ;;  %965 = vset.pattern.permute.xlu1 (!%p213_p2), %v982_v7  ;;  %v1120_v11 = vshrl.u32 (!%p213_p2), %v280_v10, 7  ;;  %v1122_v12 = vand.u32 (!%p213_p2), 127, %v280_v10  ;;  %v1133_v15 = vld [vmem:[%s1544_s1 + $0x8] sm:$0xff] (!%p213_p2) }
   0x8   : > { %s978_s7 = smov (!%p213_p2), 127   ;;  %s979_s8 = smov (!%p213_p2), 113  }
   0x9   : > { %s980_s9 = smov (!%p213_p2), 112   ;;  %s981_s12 = smov (!%p213_p2), 111   ;;  %v289_v13 = vsub.s32 (!%p213_p2), 0, %v1120_v11  ;;  %vm282_vm1 = vcmp.lt.s32.totalorder (!%p213_p2), %v1122_v12, 17  ;;  %v314_v26 = vsub.s32 (!%p213_p2), 1, %v1120_v11  ;;  %vm307_vm2 = vcmp.lt.s32.totalorder (!%p213_p2), %v1122_v12, 16 }
   0xa   : > { %v339_v39 = vsub.s32 (!%p213_p2), 2, %v1120_v11  ;;  %vm332_vm3 = vcmp.lt.s32.totalorder (!%p213_p2), %v1122_v12, 15  ;;  %v364_v56 = vsub.s32 (!%p213_p2), 3, %v1120_v11  ;;  %vm357_vm4 = vcmp.lt.s32.totalorder (!%p213_p2), %v1122_v12, 1 }
   0xb   : > { %v1137_v18 = vrot.slane (!%p213_p2), %v1128_v14, %v289_v13  ;;  %v1140_v19 = vrot.slane (!%p213_p2), %v1133_v15, %v289_v13  ;;  %v1157_v35 = vrot.slane (!%p213_p2), %v1128_v14, %v314_v26  ;;  %v1160_v36 = vrot.slane (!%p213_p2), %v1133_v15, %v314_v26 }
   0xc   : > { %v1177_v52 = vrot.slane (!%p213_p2), %v1128_v14, %v339_v39  ;;  %v1180_v53 = vrot.slane (!%p213_p2), %v1133_v15, %v339_v39  ;;  %v1197_v13 = vrot.slane (!%p213_p2), %v1128_v14, %v364_v56  ;;  %vm382_vm5 = vcmp.lt.s32.totalorder (!%p213_p2), %v1122_v12, 127 }
   0xd   : > { %s1551_s22 = smov (!%p242_p3, %s856_s22), 1  ;;  %vm407_vm6 = vcmp.lt.s32.totalorder %v1122_v12, 113  ;;  %vm432_vm7 = vcmp.lt.s32.totalorder %v1122_v12, 112  ;;  %vm457_vm8 = vcmp.lt.s32.totalorder %v1122_v12, 111  ;;  %v260_v12 = vld [vmem:[%s1547_s4] sm:$0xff] }
   0xe   : > { %s873_s23 = sshll.u32 %s1551_s22, 5 }
   0xf   : > { %s246_s26 = scalar_lea.vmem %s1543_s0, %s873_s23  ;;  %s251_s10 = scalar_lea.vmem %s1549_s6, %s873_s23 }
  0x10   : > { %v1034_v0 = vld [vmem:[%s246_s26 + $0x8] sm:$0xff]  ;;  %v1036_v1 = vld [vmem:[%s246_s26] sm:$0xff]  ;;  %v1042_v2 = vld [vmem:[%s246_s26 + $0x18] sm:$0xff] }
  0x11   : > { %276 = vrot.lane.b32.xlu1 %v1034_v0, %s974_s27  ;;  %272 = vrot.lane.b32.xlu0 %v1036_v1, %s974_s27  ;;  %v1044_v3 = vld [vmem:[%s246_s26 + $0x10] sm:$0xff]  ;;  %v891_v4 = vpack.c.bf16 %v1042_v2, %v1034_v0 }
  0x12   : > { %v893_v5 = vpack.c.bf16 %v1044_v3, %v1036_v1 }
  0x15   : > { %278 = vrot.lane.b32.xlu1 %v1042_v2, %s974_s27  ;;  %274 = vrot.lane.b32.xlu0 %v1044_v3, %s974_s27 }
  0x19   : > { %301 = vrot.lane.b32.xlu1 %v1044_v3, %s975_s28  ;;  %299 = vrot.lane.b32.xlu0 %v1036_v1, %s975_s28 }
  0x1d   : > { %305 = vrot.lane.b32.xlu1 %v1042_v2, %s975_s28  ;;  %303 = vrot.lane.b32.xlu0 %v1034_v0, %s975_s28 }
  0x21   : > { %326 = vrot.lane.b32.xlu1 %v1044_v3, %s976_s29  ;;  %324 = vrot.lane.b32.xlu0 %v1036_v1, %s976_s29 }
  0x25   : > { %330 = vrot.lane.b32.xlu1 %v1042_v2, %s976_s29  ;;  %328 = vrot.lane.b32.xlu0 %v1034_v0, %s976_s29 }
  0x29   : > { %351 = vrot.lane.b32.xlu1 %v1044_v3, %s977_s30  ;;  %349 = vrot.lane.b32.xlu0 %v1036_v1, %s977_s30 }
  0x2d   : > { %355 = vrot.lane.b32.xlu1 %v1042_v2, %s977_s30  ;;  %353 = vrot.lane.b32.xlu0 %v1034_v0, %s977_s30 }
  0x31   : > { %376 = vrot.lane.b32.xlu1 %v1044_v3, %s978_s7  ;;  %374 = vrot.lane.b32.xlu0 %v1036_v1, %s978_s7 }
  0x35   : > { %380 = vrot.lane.b32.xlu1 %v1042_v2, %s978_s7  ;;  %378 = vrot.lane.b32.xlu0 %v1034_v0, %s978_s7 }
  0x39   : > { %401 = vrot.lane.b32.xlu1 %v1044_v3, %s979_s8  ;;  %399 = vrot.lane.b32.xlu0 %v1036_v1, %s979_s8 }
  0x3d   : > { %405 = vrot.lane.b32.xlu1 %v1042_v2, %s979_s8  ;;  %403 = vrot.lane.b32.xlu0 %v1034_v0, %s979_s8 }
  0x41   : > { %426 = vrot.lane.b32.xlu1 %v1044_v3, %s980_s9  ;;  %424 = vrot.lane.b32.xlu0 %v1036_v1, %s980_s9 }
  0x45   : > { %430 = vrot.lane.b32.xlu1 %v1042_v2, %s980_s9  ;;  %428 = vrot.lane.b32.xlu0 %v1034_v0, %s980_s9 }
  0x49   : > { %451 = vrot.lane.b32.xlu1 %v1044_v3, %s981_s12  ;;  %449 = vrot.lane.b32.xlu0 %v1036_v1, %s981_s12 }
  0x4d   : > { %455 = vrot.lane.b32.xlu1 %v1042_v2, %s981_s12  ;;  %453 = vrot.lane.b32.xlu0 %v1034_v0, %s981_s12 }
  0x51   : > { %476 = vperm.xlu0 %964, %v264_v8   ;;  %481 = vperm.xlu1 %965, %v265_v9  }
  0x83   : > { %v277_v16 = vpop.permute.xlu1 %276  ;;  %v273_v17 = vpop.permute.xlu0 %272 }
  0x84   : > { %v283_v20 = vsel %vm282_vm1, %v273_v17, %v277_v16  ;;  %v285_v21 = vsel %vm282_vm1, %v277_v16, %v273_v17  ;;  %v1200_v16 = vrot.slane %v1133_v15, %v364_v56  ;;  %v439_v56 = vsub.s32 7, %v1120_v11 }
  0x85   : > { %v295_v27 = vmul.f32 %v1137_v18, %v285_v21  ;;  %v296_v29 = vmul.f32 %v1140_v19, %v283_v20  ;;  %v389_v21 = vsub.s32 5, %v1120_v11 }
  0x87   : > { %v279_v22 = vpop.permute.xlu1 %278  ;;  %v275_v23 = vpop.permute.xlu0 %274 }
  0x88   : > { %v284_v24 = vsel %vm282_vm1, %v275_v23, %v279_v22  ;;  %v286_v25 = vsel %vm282_vm1, %v279_v22, %v275_v23 }
  0x89   : > { %v297_v28 = vmul.f32 %v1137_v18, %v286_v25  ;;  %v298_v30 = vmul.f32 %v1140_v19, %v284_v24 }
  0x8b   : > { %v302_v31 = vpop.permute.xlu1 %301  ;;  %v300_v32 = vpop.permute.xlu0 %299  ;;  %v875_v33 = vpack.c.bf16 %v298_v30, %v296_v29  ;;  %v877_v34 = vpack.c.bf16 %v297_v28, %v295_v27 }
  0x8d   : > { %876 = vmatprep.subr.bf16.mxu0 %v875_v33 }
  0x8e   : > { %878 = vmatpush1.bf16.msra.mxu0 %v877_v34  ;;  %v1217_v34 = vrot.slane %v1128_v14, %v389_v21 }
  0x8f   : > { %v306_v37 = vpop.permute.xlu1 %305  ;;  %v304_v38 = vpop.permute.xlu0 %303 }
  0x90   : > { %v309_v40 = vsel %vm307_vm2, %v302_v31, %v306_v37  ;;  %v311_v41 = vsel %vm307_vm2, %v306_v37, %v302_v31  ;;  %v308_v42 = vsel %vm307_vm2, %v300_v32, %v304_v38  ;;  %v310_v43 = vsel %vm307_vm2, %v304_v38, %v300_v32 }
  0x91   : > { %v322_v44 = vmul.f32 %v1157_v35, %v311_v41  ;;  %v323_v45 = vmul.f32 %v1160_v36, %v309_v40  ;;  %v320_v46 = vmul.f32 %v1157_v35, %v310_v43  ;;  %v321_v47 = vmul.f32 %v1160_v36, %v308_v42 }
  0x92   : > { %v1220_v37 = vrot.slane %v1133_v15, %v389_v21  ;;  %v414_v40 = vsub.s32 6, %v1120_v11 }
  0x93   : > { %v327_v48 = vpop.permute.xlu1 %326  ;;  %v325_v49 = vpop.permute.xlu0 %324  ;;  %v879_v50 = vpack.c.bf16 %v323_v45, %v321_v47  ;;  %v881_v51 = vpack.c.bf16 %v322_v44, %v320_v46 }
  0x95   : > { %880 = vmatprep.subr.bf16.mxu0 %v879_v50  ;;  %v1243_v50 = vrot.slane %v1128_v14, %v414_v40 }
  0x96   : > { %882 = vmatpush1.bf16.msra.mxu0 %v881_v51  ;;  %v1246_v51 = vrot.slane %v1133_v15, %v414_v40 }
  0x97   : > { %v331_v54 = vpop.permute.xlu1 %330  ;;  %v329_v55 = vpop.permute.xlu0 %328 }
  0x98   : > { %v334_v57 = vsel %vm332_vm3, %v327_v48, %v331_v54  ;;  %v336_v58 = vsel %vm332_vm3, %v331_v54, %v327_v48  ;;  %v333_v59 = vsel %vm332_vm3, %v325_v49, %v329_v55  ;;  %v335_v60 = vsel %vm332_vm3, %v329_v55, %v325_v49 }
  0x99   : > { %v347_v61 = vmul.f32 %v1177_v52, %v336_v58  ;;  %v348_v62 = vmul.f32 %v1180_v53, %v334_v57  ;;  %v345_v63 = vmul.f32 %v1177_v52, %v335_v60  ;;  %v346_v6 = vmul.f32 %v1180_v53, %v333_v59 }
  0x9b   : > { %v352_v7 = vpop.permute.xlu1 %351  ;;  %v350_v8 = vpop.permute.xlu0 %349  ;;  %v883_v9 = vpack.c.bf16 %v348_v62, %v346_v6  ;;  %v885_v10 = vpack.c.bf16 %v347_v61, %v345_v63 }
  0x9d   : > { %884 = vmatprep.subr.bf16.mxu0 %v883_v9 }
  0x9e   : > { %886 = vmatpush1.bf16.msra.mxu0 %v885_v10 }
  0x9f   : > { %v356_v17 = vpop.permute.xlu1 %355  ;;  %v354_v20 = vpop.permute.xlu0 %353 }
  0xa0   : > { %v359_v22 = vsel %vm357_vm4, %v352_v7, %v356_v17  ;;  %v361_v23 = vsel %vm357_vm4, %v356_v17, %v352_v7  ;;  %v358_v24 = vsel %vm357_vm4, %v350_v8, %v354_v20  ;;  %v360_v25 = vsel %vm357_vm4, %v354_v20, %v350_v8 }
  0xa1   : > { %v372_v26 = vmul.f32 %v1197_v13, %v361_v23  ;;  %v373_v27 = vmul.f32 %v1200_v16, %v359_v22  ;;  %v370_v28 = vmul.f32 %v1197_v13, %v360_v25  ;;  %v371_v29 = vmul.f32 %v1200_v16, %v358_v24 }
  0xa2   : > { %v1263_v7 = vrot.slane %v1128_v14, %v439_v56  ;;  %v1266_v8 = vrot.slane %v1133_v15, %v439_v56 }
  0xa3   : > { %v377_v30 = vpop.permute.xlu1 %376  ;;  %v375_v31 = vpop.permute.xlu0 %374  ;;  %v887_v32 = vpack.c.bf16 %v373_v27, %v371_v29  ;;  %v889_v33 = vpack.c.bf16 %v372_v26, %v370_v28  ;;  %v1284_v29 = vld [vmem:[%s1544_s1 + $0x10] ss:$0 sm:$0xff] }
  0xa5   : > { %888 = vmatprep.subr.bf16.mxu0 %v887_v32 }
  0xa6   : > { %890 = vmatpush1.bf16.msra.mxu0 %v889_v33 }
  0xa7   : > { %v381_v38 = vpop.permute.xlu1 %380  ;;  %v379_v39 = vpop.permute.xlu0 %378  ;;  %892 = vmatprep.subr.bf16.mxu0 %v891_v4 }
  0xa8   : > { %v384_v41 = vsel %vm382_vm5, %v377_v30, %v381_v38  ;;  %v386_v42 = vsel %vm382_vm5, %v381_v38, %v377_v30  ;;  %v383_v43 = vsel %vm382_vm5, %v375_v31, %v379_v39  ;;  %v385_v44 = vsel %vm382_vm5, %v379_v39, %v375_v31  ;;  %v1289_v30 = vld [vmem:[%s1544_s1 + $0x18] ss:$0 sm:$0xff] }
  0xa9   : > { %v397_v45 = vmul.f32 %v1217_v34, %v384_v41  ;;  %v398_v46 = vmul.f32 %v1220_v37, %v386_v42  ;;  %v395_v0 = vmul.f32 %v1217_v34, %v383_v43  ;;  %v396_v2 = vmul.f32 %v1220_v37, %v385_v44 }
  0xaa   : > { %894 = vmatpush1.bf16.msra.mxu0 %v893_v5 }
  0xab   : > { %v402_v4 = vpop.permute.xlu1 %401  ;;  %v400_v47 = vpop.permute.xlu0 %399  ;;  %v895_v48 = vpack.c.bf16 %v398_v46, %v396_v2  ;;  %v897_v49 = vpack.c.bf16 %v397_v45, %v395_v0  ;;  %v256_v0 = vld [vmem:[%s1545_s2] sm:$0xff]  ;;  %v259_v2 = vld [vmem:[%s1545_s2 + $0x18] sm:$0xff] }
  0xad   : > { %896 = vmatprep.subr.bf16.mxu0 %v895_v48 }
  0xae   : > { %898 = vmatpush1.bf16.msra.mxu0 %v897_v49 }
  0xaf   : > { %v406_v54 = vpop.permute.xlu1 %405  ;;  %v404_v55 = vpop.permute.xlu0 %403 }
  0xb0   : > { %v409_v1 = vsel %vm407_vm6, %v402_v4, %v406_v54  ;;  %v411_v3 = vsel %vm407_vm6, %v406_v54, %v402_v4  ;;  %v408_v5 = vsel %vm407_vm6, %v400_v47, %v404_v55  ;;  %v410_v57 = vsel %vm407_vm6, %v404_v55, %v400_v47  ;;  %v258_v4 = vld [vmem:[%s1545_s2 + $0x10] sm:$0xff] }
  0xb1   : > { %v422_v58 = vmul.f32 %v1243_v50, %v409_v1  ;;  %v423_v59 = vmul.f32 %v1246_v51, %v411_v3  ;;  %v420_v60 = vmul.f32 %v1243_v50, %v408_v5  ;;  %v421_v11 = vmul.f32 %v1246_v51, %v410_v57 }
  0xb3   : > { %v427_v61 = vpop.permute.xlu1 %426  ;;  %v425_v62 = vpop.permute.xlu0 %424  ;;  %v899_v63 = vpack.c.bf16 %v423_v59, %v421_v11  ;;  %v901_v6 = vpack.c.bf16 %v422_v58, %v420_v60 }
  0xb5   : > { %900 = vmatprep.subr.bf16.mxu0 %v899_v63  ;;  %v261_v63 = vld [vmem:[%s1547_s4 + $0x8] sm:$0xff] }
  0xb6   : > { %902 = vmatpush1.bf16.msra.mxu0 %v901_v6  ;;  %869 = vmatprep.mubr.msk.f32.mxu1 %vm484_vm0, %v261_v63  ;;  %v266_v6 = vld [vmem:[%s1548_s5] sm:$0xff] }
  0xb7   : > { %v431_v9 = vpop.permute.xlu1 %430  ;;  %v429_v10 = vpop.permute.xlu0 %428 }
  0xb8   : > { %v434_v17 = vsel %vm432_vm7, %v427_v61, %v431_v9  ;;  %v436_v20 = vsel %vm432_vm7, %v431_v9, %v427_v61  ;;  %v433_v21 = vsel %vm432_vm7, %v425_v62, %v429_v10  ;;  %v435_v22 = vsel %vm432_vm7, %v429_v10, %v425_v62  ;;  %v267_v9 = vld [vmem:[%s1548_s5 + $0x8] sm:$0xff] }
  0xb9   : > { %v447_v14 = vmul.f32 %v1263_v7, %v434_v17  ;;  %v448_v15 = vmul.f32 %v1266_v8, %v436_v20  ;;  %v445_v23 = vmul.f32 %v1263_v7, %v433_v21  ;;  %v446_v24 = vmul.f32 %v1266_v8, %v435_v22 }
  0xbb   : > { %v452_v25 = vpop.permute.xlu1 %451  ;;  %v450_v26 = vpop.permute.xlu0 %449  ;;  %v903_v27 = vpack.c.bf16 %v448_v15, %v446_v24  ;;  %v905_v28 = vpack.c.bf16 %v447_v14, %v445_v23 }
  0xbd   : > { %904 = vmatprep.subr.bf16.mxu0 %v903_v27 }
  0xbe   : > { %906 = vmatpush1.bf16.msra.mxu0 %v905_v28 }
  0xbf   : > { %v456_v31 = vpop.permute.xlu1 %455  ;;  %v454_v32 = vpop.permute.xlu0 %453 }
  0xc0   : > { %v459_v33 = vsel %vm457_vm8, %v452_v25, %v456_v31  ;;  %v461_v38 = vsel %vm457_vm8, %v456_v31, %v452_v25  ;;  %v458_v39 = vsel %vm457_vm8, %v450_v26, %v454_v32  ;;  %v460_v40 = vsel %vm457_vm8, %v454_v32, %v450_v26 }
  0xc1   : > { %v472_v41 = vmul.f32 %v1284_v29, %v459_v33  ;;  %v473_v42 = vmul.f32 %v1289_v30, %v461_v38  ;;  %v470_v43 = vmul.f32 %v1284_v29, %v458_v39  ;;  %v471_v44 = vmul.f32 %v1289_v30, %v460_v40 }
  0xc3   : > { %v907_v45 = vpack.c.bf16 %v473_v42, %v471_v44  ;;  %v909_v46 = vpack.c.bf16 %v472_v41, %v470_v43 }
  0xc5   : > { %908 = vmatprep.subr.bf16.mxu0 %v907_v45 }
  0xc6   : > { %910 = vmatpush1.bf16.msra.mxu0 %v909_v46 }
  0xc9   : > { %556 = vmatmul.mubr.f32.vlgmr.msra.gmra.mrb[0].mxu0 %v256_v0 }
  0xca   : > { %868 = vmatprep.mubr.msk.f32.mxu0 %vm484_vm0, %v259_v2 }
  0xcd   : > { %562 = vmatmul.mubr.f32.gmra.mrb[2].mxu0 %v258_v4 }
  0xd0   : > { %v477_v47 = vpop.permute.xlu0 %476  ;;  %v482_v55 = vpop.permute.xlu1 %481 }
 0x19c   : > { %v557_v48 = vpop.f32.mrb[0].mxu0 }
 0x19d   : > { %v558_v49 = vadd.f32 %v557_v48, %v477_v47  ;;  %v559_v54 = vpop.f32.mrb[1].mxu0 }
 0x19e   : > { %v560_v1 = vadd.f32 %v559_v54, %v477_v47 }
 0x19f   : > { %v1313_v56 = vmax.f32 %v558_v49, 0.0 }
 0x1a0   : > { %v563_v3 = vpop.f32.mrb[2].mxu0  ;;  %v1319_v60 = vmax.f32 %v560_v1, 0.0 }
 0x1a1   : > { %v564_v5 = vadd.f32 %v563_v3, %v482_v55  ;;  %v565_v57 = vpop.f32.mrb[3].mxu0  ;;  %572 = vrot.lane.b32.xlu1 %v1313_v56, %s974_s27 }
 0x1a2   : > { %v566_v58 = vadd.f32 %v565_v57, %v482_v55 }
 0x1a3   : > { %v1317_v59 = vmax.f32 %v564_v5, 0.0 }
 0x1a4   : > { %v1321_v11 = vmax.f32 %v566_v58, 0.0 }
 0x1a5   : > { %574 = vrot.lane.b32.xlu0 %v1317_v59, %s974_s27  ;;  %588 = vrot.lane.b32.xlu1 %v1313_v56, %s975_s28  ;;  %v929_v61 = vpack.c.bf16 %v1317_v59, %v1313_v56 }
 0x1a6   : > { %v927_v62 = vpack.c.bf16 %v1321_v11, %v1319_v60 }
 0x1a9   : > { %590 = vrot.lane.b32.xlu0 %v1317_v59, %s975_s28  ;;  %604 = vrot.lane.b32.xlu1 %v1313_v56, %s976_s29 }
 0x1ad   : > { %606 = vrot.lane.b32.xlu0 %v1317_v59, %s976_s29  ;;  %620 = vrot.lane.b32.xlu1 %v1313_v56, %s977_s30 }
 0x1b1   : > { %622 = vrot.lane.b32.xlu0 %v1317_v59, %s977_s30  ;;  %636 = vrot.lane.b32.xlu1 %v1313_v56, %s978_s7 }
 0x1b5   : > { %638 = vrot.lane.b32.xlu0 %v1317_v59, %s978_s7  ;;  %652 = vrot.lane.b32.xlu1 %v1313_v56, %s979_s8 }
 0x1b9   : > { %654 = vrot.lane.b32.xlu0 %v1317_v59, %s979_s8  ;;  %668 = vrot.lane.b32.xlu1 %v1313_v56, %s980_s9 }
 0x1bd   : > { %670 = vrot.lane.b32.xlu0 %v1317_v59, %s980_s9  ;;  %576 = vrot.lane.b32.xlu1 %v1319_v60, %s974_s27 }
 0x1c1   : > { %578 = vrot.lane.b32.xlu0 %v1321_v11, %s974_s27  ;;  %592 = vrot.lane.b32.xlu1 %v1319_v60, %s975_s28 }
 0x1c5   : > { %594 = vrot.lane.b32.xlu0 %v1321_v11, %s975_s28  ;;  %608 = vrot.lane.b32.xlu1 %v1319_v60, %s976_s29 }
 0x1c9   : > { %610 = vrot.lane.b32.xlu0 %v1321_v11, %s976_s29  ;;  %624 = vrot.lane.b32.xlu1 %v1319_v60, %s977_s30 }
 0x1cd   : > { %626 = vrot.lane.b32.xlu0 %v1321_v11, %s977_s30  ;;  %684 = vrot.lane.b32.xlu1 %v1313_v56, %s981_s12 }
 0x1d1   : > { %686 = vrot.lane.b32.xlu0 %v1317_v59, %s981_s12  ;;  %640 = vrot.lane.b32.xlu1 %v1319_v60, %s978_s7 }
 0x1d5   : > { %642 = vrot.lane.b32.xlu0 %v1321_v11, %s978_s7  ;;  %656 = vrot.lane.b32.xlu1 %v1319_v60, %s979_s8 }
 0x1d9   : > { %658 = vrot.lane.b32.xlu0 %v1321_v11, %s979_s8  ;;  %672 = vrot.lane.b32.xlu1 %v1319_v60, %s980_s9 }
 0x1dd   : > { %674 = vrot.lane.b32.xlu0 %v1321_v11, %s980_s9  ;;  %688 = vrot.lane.b32.xlu1 %v1319_v60, %s981_s12 }
 0x1e1   : > { %690 = vrot.lane.b32.xlu0 %v1321_v11, %s981_s12  ;;  %702 = vperm.xlu1 %965, %v266_v6  }
 0x1e5   : > { %707 = vperm.xlu0 %964, %v267_v9  }
 0x213   : > { %v573_v10 = vpop.permute.xlu1 %572 }
 0x217   : > { %v575_v17 = vpop.permute.xlu0 %574  ;;  %v589_v20 = vpop.permute.xlu1 %588 }
 0x21b   : > { %v591_v21 = vpop.permute.xlu0 %590  ;;  %v605_v22 = vpop.permute.xlu1 %604 }
 0x21f   : > { %v607_v14 = vpop.permute.xlu0 %606  ;;  %v621_v15 = vpop.permute.xlu1 %620 }
 0x223   : > { %v623_v23 = vpop.permute.xlu0 %622  ;;  %v1399_v24 = vpop.permute.xlu1 %636 }
 0x227   : > { %v1401_v25 = vpop.permute.xlu0 %638  ;;  %v1403_v26 = vpop.permute.xlu1 %652 }
 0x22b   : > { %v1405_v27 = vpop.permute.xlu0 %654  ;;  %v1407_v28 = vpop.permute.xlu1 %668 }
 0x22f   : > { %v1409_v31 = vpop.permute.xlu0 %670  ;;  %v577_v32 = vpop.permute.xlu1 %576 }
 0x230   : > { %v580_v33 = vsel %vm282_vm1, %v573_v10, %v577_v32  ;;  %v582_v38 = vsel %vm282_vm1, %v577_v32, %v573_v10 }
 0x231   : > { %v584_v43 = vmul.f32 %v582_v38, %v1137_v18  ;;  %v585_v45 = vmul.f32 %v580_v33, %v1140_v19 }
 0x233   : > { %v579_v39 = vpop.permute.xlu0 %578  ;;  %v593_v40 = vpop.permute.xlu1 %592 }
 0x234   : > { %v581_v41 = vsel %vm282_vm1, %v575_v17, %v579_v39  ;;  %v583_v42 = vsel %vm282_vm1, %v579_v39, %v575_v17  ;;  %v596_v0 = vsel %vm307_vm2, %v589_v20, %v593_v40  ;;  %v598_v2 = vsel %vm307_vm2, %v593_v40, %v589_v20 }
 0x235   : > { %v586_v44 = vmul.f32 %v583_v42, %v1137_v18  ;;  %v587_v46 = vmul.f32 %v581_v41, %v1140_v19  ;;  %v600_v55 = vmul.f32 %v598_v2, %v1157_v35  ;;  %v601_v19 = vmul.f32 %v596_v0, %v1160_v36 }
 0x237   : > { %v595_v4 = vpop.permute.xlu0 %594  ;;  %v609_v47 = vpop.permute.xlu1 %608  ;;  %v911_v48 = vpack.c.bf16 %v587_v46, %v585_v45  ;;  %v913_v49 = vpack.c.bf16 %v586_v44, %v584_v43 }
 0x238   : > { %v597_v54 = vsel %vm307_vm2, %v591_v21, %v595_v4  ;;  %v599_v18 = vsel %vm307_vm2, %v595_v4, %v591_v21  ;;  %v612_v5 = vsel %vm332_vm3, %v605_v22, %v609_v47  ;;  %v614_v57 = vsel %vm332_vm3, %v609_v47, %v605_v22 }
 0x239   : > { %v602_v1 = vmul.f32 %v599_v18, %v1157_v35  ;;  %v603_v3 = vmul.f32 %v597_v54, %v1160_v36  ;;  %912 = vmatprep.subr.bf16.mxu1 %v911_v48  ;;  %v616_v36 = vmul.f32 %v614_v57, %v1177_v52  ;;  %v617_v17 = vmul.f32 %v612_v5, %v1180_v53 }
 0x23a   : > { %914 = vmatpush1.bf16.msra.mxu1 %v913_v49 }
 0x23b   : > { %v611_v58 = vpop.permute.xlu0 %610  ;;  %v625_v63 = vpop.permute.xlu1 %624  ;;  %v915_v6 = vpack.c.bf16 %v603_v3, %v601_v19  ;;  %v917_v9 = vpack.c.bf16 %v602_v1, %v600_v55 }
 0x23c   : > { %v613_v10 = vsel %vm332_vm3, %v607_v14, %v611_v58  ;;  %v615_v35 = vsel %vm332_vm3, %v611_v58, %v607_v14  ;;  %v628_v22 = vsel %vm357_vm4, %v621_v15, %v625_v63  ;;  %v630_v32 = vsel %vm357_vm4, %v625_v63, %v621_v15 }
 0x23d   : > { %v618_v20 = vmul.f32 %v615_v35, %v1177_v52  ;;  %v619_v21 = vmul.f32 %v613_v10, %v1180_v53  ;;  %916 = vmatprep.subr.bf16.mxu1 %v915_v6  ;;  %v632_v53 = vmul.f32 %v630_v32, %v1197_v13  ;;  %v633_v41 = vmul.f32 %v628_v22, %v1200_v16 }
 0x23e   : > { %918 = vmatpush1.bf16.msra.mxu1 %v917_v9 }
 0x23f   : > { %v627_v33 = vpop.permute.xlu0 %626  ;;  %v685_v38 = vpop.permute.xlu1 %684  ;;  %v919_v39 = vpack.c.bf16 %v619_v21, %v617_v17  ;;  %v921_v14 = vpack.c.bf16 %v618_v20, %v616_v36 }
 0x240   : > { %v629_v40 = vsel %vm357_vm4, %v623_v23, %v627_v33  ;;  %v631_v52 = vsel %vm357_vm4, %v627_v33, %v623_v23  ;;  %v263_v33 = vld [vmem:[%s1547_s4 + $0x18] sm:$0xff] }
 0x241   : > { %v634_v42 = vmul.f32 %v631_v52, %v1197_v13  ;;  %v635_v43 = vmul.f32 %v629_v40, %v1200_v16  ;;  %920 = vmatprep.subr.bf16.mxu1 %v919_v39 }
 0x242   : > { %922 = vmatpush1.bf16.msra.mxu1 %v921_v14 }
 0x243   : > { %v687_v15 = vpop.permute.xlu0 %686  ;;  %v641_v44 = vpop.permute.xlu1 %640  ;;  %v923_v45 = vpack.c.bf16 %v635_v43, %v633_v41  ;;  %v925_v46 = vpack.c.bf16 %v634_v42, %v632_v53 }
 0x244   : > { %v644_v0 = vsel %vm382_vm5, %v1399_v24, %v641_v44  ;;  %v646_v23 = vsel %vm382_vm5, %v641_v44, %v1399_v24 }
 0x245   : > { %924 = vmatprep.subr.bf16.mxu1 %v923_v45  ;;  %v648_v47 = vmul.f32 %v644_v0, %v1217_v34  ;;  %v649_v48 = vmul.f32 %v646_v23, %v1220_v37 }
 0x246   : > { %926 = vmatpush1.bf16.msra.mxu1 %v925_v46 }
 0x247   : > { %v643_v2 = vpop.permute.xlu0 %642  ;;  %928 = vmatprep.subr.bf16.mxu1 %v927_v62  ;;  %v657_v13 = vpop.permute.xlu1 %656 }
 0x248   : > { %v645_v16 = vsel %vm382_vm5, %v1401_v25, %v643_v2  ;;  %v647_v4 = vsel %vm382_vm5, %v643_v2, %v1401_v25  ;;  %v660_v60 = vsel %vm407_vm6, %v1403_v26, %v657_v13  ;;  %v662_v11 = vsel %vm407_vm6, %v657_v13, %v1403_v26 }
 0x249   : > { %v650_v24 = vmul.f32 %v645_v16, %v1217_v34  ;;  %v651_v49 = vmul.f32 %v647_v4, %v1220_v37  ;;  %v664_v55 = vmul.f32 %v660_v60, %v1243_v50  ;;  %v665_v26 = vmul.f32 %v662_v11, %v1246_v51 }
 0x24a   : > { %930 = vmatpush1.bf16.msra.mxu1 %v929_v61 }
 0x24b   : > { %v659_v62 = vpop.permute.xlu0 %658  ;;  %v673_v25 = vpop.permute.xlu1 %672  ;;  %v931_v54 = vpack.c.bf16 %v651_v49, %v649_v48  ;;  %v933_v18 = vpack.c.bf16 %v650_v24, %v648_v47 }
 0x24c   : > { %v661_v34 = vsel %vm407_vm6, %v1405_v27, %v659_v62  ;;  %v663_v37 = vsel %vm407_vm6, %v659_v62, %v1405_v27  ;;  %v676_v59 = vsel %vm432_vm7, %v1407_v28, %v673_v25  ;;  %v678_v61 = vsel %vm432_vm7, %v673_v25, %v1407_v28 }
 0x24d   : > { %v666_v19 = vmul.f32 %v661_v34, %v1243_v50  ;;  %v667_v56 = vmul.f32 %v663_v37, %v1246_v51  ;;  %932 = vmatprep.subr.bf16.mxu1 %v931_v54  ;;  %v680_v57 = vmul.f32 %v676_v59, %v1263_v7  ;;  %v681_v58 = vmul.f32 %v678_v61, %v1266_v8 }
 0x24e   : > { %934 = vmatpush1.bf16.msra.mxu1 %v933_v18 }
 0x24f   : > { %v675_v1 = vpop.permute.xlu0 %674  ;;  %v689_v27 = vpop.permute.xlu1 %688  ;;  %v935_v3 = vpack.c.bf16 %v667_v56, %v665_v26  ;;  %v937_v5 = vpack.c.bf16 %v666_v19, %v664_v55 }
 0x250   : > { %v677_v50 = vsel %vm432_vm7, %v1409_v31, %v675_v1  ;;  %v679_v51 = vsel %vm432_vm7, %v675_v1, %v1409_v31  ;;  %v692_v6 = vsel %vm457_vm8, %v685_v38, %v689_v27  ;;  %v694_v9 = vsel %vm457_vm8, %v689_v27, %v685_v38 }
 0x251   : > { %v682_v63 = vmul.f32 %v677_v50, %v1263_v7  ;;  %v683_v28 = vmul.f32 %v679_v51, %v1266_v8  ;;  %936 = vmatprep.subr.bf16.mxu1 %v935_v3  ;;  %v696_v7 = vmul.f32 %v1284_v29, %v692_v6  ;;  %v697_v8 = vmul.f32 %v1289_v30, %v694_v9 }
 0x252   : > { %938 = vmatpush1.bf16.msra.mxu1 %v937_v5 }
 0x253   : > { %v691_v10 = vpop.permute.xlu0 %690  ;;  %v939_v35 = vpack.c.bf16 %v683_v28, %v681_v58  ;;  %v941_v36 = vpack.c.bf16 %v682_v63, %v680_v57 }
 0x254   : > { %v693_v31 = vsel %vm457_vm8, %v687_v15, %v691_v10  ;;  %v695_v17 = vsel %vm457_vm8, %v691_v10, %v687_v15 }
 0x255   : > { %v698_v20 = vmul.f32 %v1284_v29, %v693_v31  ;;  %v699_v21 = vmul.f32 %v1289_v30, %v695_v17  ;;  %940 = vmatprep.subr.bf16.mxu1 %v939_v35  ;;  %v262_v29 = vld [vmem:[%s1547_s4 + $0x10] sm:$0xff] }
 0x256   : > { %942 = vmatpush1.bf16.msra.mxu1 %v941_v36 }
 0x257   : > { %v943_v22 = vpack.c.bf16 %v699_v21, %v697_v8  ;;  %v945_v32 = vpack.c.bf16 %v698_v20, %v696_v7 }
 0x259   : > { %944 = vmatprep.subr.bf16.mxu1 %v943_v22 }
 0x25a   : > { %946 = vmatpush1.bf16.msra.mxu1 %v945_v32 }
 0x25d   : > { %781 = vmatmul.mubr.f32.vlgmr.msra.gmra.mrb[0].mxu1 %v260_v12 }
 0x25e   : > { %870 = vmatprep.mubr.msk.f32.mxu1 %vm484_vm0, %v263_v33 }
 0x260   : > { %v703_v30 = vpop.permute.xlu1 %702 }
 0x261   : > { %787 = vmatmul.mubr.f32.gmra.mrb[2].mxu1 %v262_v29 }
 0x264   : > { %v708_v53 = vpop.permute.xlu0 %707 }
 0x330   : > { %v782_v38 = vpop.f32.mrb[0].mxu1 }
 0x331   : > { %v783_v39 = vadd.f32 %v782_v38, %v703_v30  ;;  %v784_v14 = vpop.f32.mrb[1].mxu1 }
 0x332   : > { %v785_v40 = vadd.f32 %v784_v14, %v703_v30 }
 0x333   : > { %v793_v52 = vmax.f32 %v783_v39, 0.0 }
 0x334   : > { %v794_v41 = vmax.f32 %v785_v40, 0.0  ;;  %v788_v42 = vpop.f32.mrb[2].mxu1 }
 0x335   : > { %797 = vst [vmem:[%s251_s10] sm:$0xff] %v793_v52  ;;  %v789_v43 = vadd.f32 %v788_v42, %v708_v53  ;;  %v790_v15 = vpop.f32.mrb[3].mxu1 }
 0x336   : > { %798 = vst [vmem:[%s251_s10 + $0x8] sm:$0xff] %v794_v41  ;;  %v791_v44 = vadd.f32 %v790_v15, %v708_v53 }
 0x337   : > { %v795_v45 = vmax.f32 %v789_v43, 0.0 }
 0x338   : > { %v796_v46 = vmax.f32 %v791_v44, 0.0 }
 0x339   : > { %799 = vst [vmem:[%s251_s10 + $0x10] sm:$0xff] %v795_v45 }
 0x33a   : > { %800 = vst [vmem:[%s251_s10 + $0x18] sm:$0xff] %v796_v46 }
 0x33b PF: > { %s16_s21 = sadd.s32 1, %s972_s21  }
 0x33c   : > { %p13_p4 = scmp.ge.s32.totalorder %s16_s21, 4  }
 0x33e   :  { %15 = sbr.rel (!%p13_p4) target bundleno = 1 (0x1), region = 74 }

</bundles_post_ra>
